<compile_context>
chip_gen: v5e
topology: v5e:2x2
jax: 0.10.0
libtpu: 0.0.40
codegen_flags: <defaults>
</compile_context>

<pallas_src>
import jax
import jax.numpy as jnp
from jax.experimental import pallas as pl
from jax.experimental.pallas import tpu as pltpu

CIN, COUT, KH, KW = 5, 5, 3, 3


def _convt_gemm_kernel(w2_ref, p_ref, b_ref, o_ref):
    # w2_ref: VMEM (COUT, CIN*KH*KW)      spatially-flipped weights, row-major taps
    # p_ref : VMEM (CIN*KH*KW, N*OH*OW)   im2col patches of the (K-1)-padded input
    # b_ref : VMEM (COUT, 1)              bias column (broadcast over lanes)
    # o_ref : VMEM (COUT, N*OH*OW)        lane-dense output slab
    acc = jnp.dot(w2_ref[...], p_ref[...], preferred_element_type=jnp.float32)
    o_ref[...] = (acc + b_ref[...]).astype(o_ref.dtype)


def conv_transpose2d(x, weight, bias):
    """x: (N, CIN, H, W) f32; weight: (CIN, COUT, KH, KW); bias: (COUT,).
    Returns (N, COUT, H+KH-1, W+KW-1), matching torch.nn.ConvTranspose2d(5,5,(3,3))."""
    N, C, H, W = x.shape
    assert C == CIN and weight.shape == (CIN, COUT, KH, KW)
    OH, OW = H + KH - 1, W + KW - 1
    K = CIN * KH * KW          # 45
    M = N * OH * OW            # lane-dense GEMM N-dim

    # --- wrapper-side layout plumbing (fused by XLA, not compute) ------------
    # W2[co, (ci*KH + kh)*KW + kw] = weight[ci, co, KH-1-kh, KW-1-kw]
    w2 = jnp.transpose(weight[:, :, ::-1, ::-1], (1, 0, 2, 3)).reshape(COUT, K)
    # Zero-pad by (K-1) and gather the KH*KW shifted windows (im2col):
    xpad = jnp.pad(x, ((0, 0), (0, 0), (KH - 1, KH - 1), (KW - 1, KW - 1)))
    wins = jnp.stack(
        [xpad[:, :, kh:kh + OH, kw:kw + OW] for kh in range(KH) for kw in range(KW)],
        axis=0)                                            # (KH*KW, N, CIN, OH, OW)
    patches = jnp.transpose(wins, (2, 0, 1, 3, 4)).reshape(K, M)

    cost = pl.CostEstimate(
        flops=2 * COUT * K * M,
        transcendentals=0,
        bytes_accessed=4 * (COUT * K + K * M + COUT + COUT * M),
    )

    out = pl.pallas_call(
        _convt_gemm_kernel,
        out_shape=jax.ShapeDtypeStruct((COUT, M), x.dtype),
        in_specs=[
            pl.BlockSpec(memory_space=pltpu.MemorySpace.VMEM),   # W2  (5, 45)
            pl.BlockSpec(memory_space=pltpu.MemorySpace.VMEM),   # P   (45, 648)
            pl.BlockSpec(memory_space=pltpu.MemorySpace.VMEM),   # bias (5, 1)
        ],
        out_specs=pl.BlockSpec(memory_space=pltpu.MemorySpace.VMEM),
        cost_estimate=cost,
    )(w2, patches, bias.reshape(COUT, 1))

    # (COUT, N*OH*OW) -> (N, COUT, OH, OW)
    return jnp.transpose(out.reshape(COUT, N, OH, OW), (1, 0, 2, 3))


if __name__ == "__main__":
    key = jax.random.PRNGKey(0)
    kx, kw, kb = jax.random.split(key, 3)

    # Deterministic synthetic parameters (PyTorch-style uniform bound).
    fan_in = CIN * KH * KW
    bound = 1.0 / (fan_in ** 0.5)
    weight = jax.random.uniform(kw, (CIN, COUT, KH, KW), jnp.float32, -bound, bound)
    bias = jax.random.uniform(kb, (COUT,), jnp.float32, -bound, bound)

    x = jax.random.normal(kx, (2, CIN, 16, 16), dtype=jnp.float32)

    y = jax.block_until_ready(conv_transpose2d(x, weight, bias))

    # Reference: transposed conv == VALID conv over (K-1)-padded input with a
    # spatially flipped, in/out-channel-swapped kernel.
    rhs = jnp.transpose(weight[:, :, ::-1, ::-1], (1, 0, 2, 3))     # OIHW
    xpad = jnp.pad(x, ((0, 0), (0, 0), (KH - 1, KH - 1), (KW - 1, KW - 1)))
    ref = jax.lax.conv_general_dilated(
        xpad, rhs, window_strides=(1, 1), padding="VALID",
        dimension_numbers=("NCHW", "OIHW", "NCHW")) + bias[None, :, None, None]

    assert y.shape == (2, COUT, 18, 18), y.shape
    assert jnp.allclose(y, ref, atol=1e-4, rtol=1e-4)
    print("KERNEL_OK")
</pallas_src>

<mosaic_0001>
module attributes {stable_mosaic.version = 11 : i64} {
  func.func @_convt_gemm_kernel(%arg0: memref<5x45xf32, #tpu.memory_space<vmem>>, %arg1: memref<45x648xf32, #tpu.memory_space<vmem>>, %arg2: memref<5x1xf32, #tpu.memory_space<vmem>>, %arg3: memref<5x648xf32, #tpu.memory_space<vmem>>) attributes {dimension_semantics = [], scalar_prefetch = 0 : i64, scratch_operands = 0 : i64, tpu.core_type = #tpu.core_type<tc>} {
    %c0 = arith.constant 0 : index
    %c0_0 = arith.constant 0 : index
    %0 = vector.load %arg0[%c0, %c0_0] : memref<5x45xf32, #tpu.memory_space<vmem>>, vector<5x45xf32>
    %c0_1 = arith.constant 0 : index
    %c0_2 = arith.constant 0 : index
    %1 = vector.load %arg1[%c0_1, %c0_2] : memref<45x648xf32, #tpu.memory_space<vmem>>, vector<45x648xf32>
    %cst = arith.constant dense<0.000000e+00> : vector<5x648xf32>
    %2 = tpu.matmul %0, %1, %cst {dimension_numbers = #tpu.dot_dimension_numbers<[1], [0], [0], [1], [0, 0, 1, 1], [], []>} : vector<5x45xf32>, vector<45x648xf32>, vector<5x648xf32> -> vector<5x648xf32>
    %c0_3 = arith.constant 0 : index
    %c0_4 = arith.constant 0 : index
    %3 = vector.load %arg2[%c0_3, %c0_4] : memref<5x1xf32, #tpu.memory_space<vmem>>, vector<5x1xf32>
    %4 = vector.broadcast %3 : vector<5x1xf32> to vector<5x648xf32>
    %5 = arith.addf %2, %4 : vector<5x648xf32>
    %c0_5 = arith.constant 0 : index
    %c0_6 = arith.constant 0 : index
    %6 = vector.load %arg3[%c0_5, %c0_6] : memref<5x648xf32, #tpu.memory_space<vmem>>, vector<5x648xf32>
    tpu.vector_store %arg3[%c0_5, %c0_6], %5 {strides = array<i32>} : memref<5x648xf32, #tpu.memory_space<vmem>>, vector<5x648xf32>,
    return
  }
}

</mosaic_0001>

<bundles_post_ra>
// kernel: tpu_custom_call.1
= control target key start
LH: loop header
LB: loop body
LE: loop exit
PB: predicated region body
PF: predicated region fallthrough
CT: control target
= control target key end

     0   :  { %8 = vsyncpa [#allocation3], 0  ;;  %s360_s0 = inlined_call_operand.vmem [shape: f32[5,45], index: 0, kind: input, shape index: {}]   ;;  %s361_s1 = inlined_call_operand.hbm [shape: f32[45,648], index: 1, kind: input, shape index: {}]   ;;  %s362_s2 = inlined_call_operand.vmem [shape: f32[5,1], index: 2, kind: input, shape index: {}]   ;;  %s363_s3 = inlined_call_operand.hbm [shape: f32[5,648], index: 3, kind: output, shape index: {}]  }
   0x1   :  { %9 = vsyncpa [#allocation4], 0  ;;  %s16_s14 = sshll.u32 %s361_s1, 4  ;;  %s311_s15 = smov [#allocation2]   ;;  %s17_s14 = int_to_ptr.hbm [resolvable:$true] %s16_s14 }
   0x2   :  { %s18_s16 = sshll.u32 %s311_s15, 4  ;;  %s312_s17 = smov 768   ;;  %s19_s16 = int_to_ptr.vmem [resolvable:$true] %s18_s16 }
   0x3   :  { %s313_s18 = smov 48  }
   0x4   :  { %24 = dma.hbm_to_vmem [thread:$0]  %s17_s14, 4608, %s19_s16, [#allocation3], %s312_s17, %s312_s17, %s313_s18  }
   0x5   :  { %307 = dma.done.wait [#allocation3], 4608  }
   0x6   :  { %308 = vsyncadd [#allocation3], 4294962688  ;;  %v314_v0 = vmov 0   ;;  %vm78_vm0 = vcmask 1044480   ;;  %v62_v1 = vld [vmem:[#allocation2 + $0xf0] sm:$0x1f] }
   0x7   :  { %258 = vset.pattern.permute.xlu0 %v314_v0  ;;  %v63_v2 = vld [vmem:[#allocation2 + $0xf8] sm:$0x1f]  ;;  %v56_v3 = vld [vmem:[#allocation2 + $0xc0] sm:$0xff]  ;;  %241 = vmatpush.msk.msra.mxu0 %vm78_vm0, %v62_v1  ;;  %v57_v4 = vld [vmem:[#allocation2 + $0xc8] sm:$0xff]  ;;  %vm74_vm1 = vcmask 367616   ;;  %s231_s24 = sshll.u32 %s363_s3, 4  ;;  %s232_s24 = int_to_ptr.hbm [resolvable:$true] %s231_s24 }
   0x8   :  { %243 = vmatpush.msk.msra.mxu1 %vm78_vm0, %v63_v2  ;;  %v50_v5 = vld [vmem:[#allocation2 + $0x90] sm:$0xff]  ;;  %v51_v6 = vld [vmem:[#allocation2 + $0x98] sm:$0xff]  ;;  %v64_v7 = vld [vmem:[#allocation2 + $0x100] sm:$0x1f]  ;;  %vm222_vm2 = vcmask 61440  }
   0x9   :  { %v65_v8 = vld [vmem:[#allocation2 + $0x108] sm:$0x1f]  ;;  %108 = vmatpush.msra.mxu0 %v56_v3  ;;  %v58_v9 = vld [vmem:[#allocation2 + $0xd0] sm:$0xff]  ;;  %v59_v10 = vld [vmem:[#allocation2 + $0xd8] sm:$0xff]  ;;  %245 = vmatpush.msk.msra.mxu2 %vm78_vm0, %v64_v7 }
   0xa   :  { %128 = vmatpush.msra.mxu1 %v57_v4  ;;  %247 = vmatpush.msk.msra.mxu3 %vm78_vm0, %v65_v8  ;;  %v44_v11 = vld [vmem:[#allocation2 + $0x60] sm:$0xff]  ;;  %v45_v12 = vld [vmem:[#allocation2 + $0x68] sm:$0xff]  ;;  %v38_v15 = vld [vmem:[#allocation2 + $0x30] sm:$0xff] }
   0xb   :  { %109 = vmatpush.msra.mxu0 %v50_v5  ;;  %v52_v13 = vld [vmem:[#allocation2 + $0xa0] sm:$0xff]  ;;  %v53_v14 = vld [vmem:[#allocation2 + $0xa8] sm:$0xff]  ;;  %148 = vmatpush.msra.mxu2 %v58_v9  ;;  %v39_v16 = vld [vmem:[#allocation2 + $0x38] sm:$0xff] }
   0xc   :  { %129 = vmatpush.msra.mxu1 %v51_v6  ;;  %168 = vmatpush.msra.mxu3 %v59_v10  ;;  %v46_v17 = vld [vmem:[#allocation2 + $0x70] sm:$0xff]  ;;  %v47_v18 = vld [vmem:[#allocation2 + $0x78] sm:$0xff]  ;;  %v32_v19 = vld [vmem:[#allocation2] sm:$0xff] }
   0xd   :  { %110 = vmatpush.msra.mxu0 %v44_v11  ;;  %149 = vmatpush.msra.mxu2 %v52_v13  ;;  %v33_v20 = vld [vmem:[#allocation2 + $0x8] sm:$0xff]  ;;  %v66_v21 = vld [vmem:[#allocation2 + $0x110] sm:$0x1f]  ;;  %v67_v22 = vld [vmem:[#allocation2 + $0x118] sm:$0x1f] }
   0xe   :  { %130 = vmatpush.msra.mxu1 %v45_v12  ;;  %169 = vmatpush.msra.mxu3 %v53_v14  ;;  %v40_v23 = vld [vmem:[#allocation2 + $0x40] sm:$0xff]  ;;  %v41_v24 = vld [vmem:[#allocation2 + $0x48] sm:$0xff]  ;;  %v34_v28 = vld [vmem:[#allocation2 + $0x10] sm:$0xff] }
   0xf   :  { %111 = vmatpush.msra.mxu0 %v38_v15  ;;  %150 = vmatpush.msra.mxu2 %v46_v17  ;;  %v60_v25 = vld [vmem:[#allocation2 + $0xe0] sm:$0xff]  ;;  %v61_v26 = vld [vmem:[#allocation2 + $0xe8] sm:$0xff]  ;;  %v35_v29 = vld [vmem:[#allocation2 + $0x18] sm:$0xff] }
  0x10   :  { %131 = vmatpush.msra.mxu1 %v39_v16  ;;  %170 = vmatpush.msra.mxu3 %v47_v18  ;;  %v31_v27 = vld [vmem:[%s360_s0] sm:$0x1f]  ;;  %v54_v30 = vld [vmem:[#allocation2 + $0xb0] sm:$0xff]  ;;  %v55_v31 = vld [vmem:[#allocation2 + $0xb8] sm:$0xff] }
  0x11   :  { %112 = vmatpush.msra.mxu0 %v32_v19  ;;  %151 = vmatpush.msra.mxu2 %v40_v23  ;;  %v48_v32 = vld [vmem:[#allocation2 + $0x80] sm:$0xff]  ;;  %v49_v33 = vld [vmem:[#allocation2 + $0x88] sm:$0xff]  ;;  %v42_v35 = vld [vmem:[#allocation2 + $0x50] sm:$0xff] }
  0x12   :  { %132 = vmatpush.msra.mxu1 %v33_v20  ;;  %171 = vmatpush.msra.mxu3 %v41_v24  ;;  %v68_v34 = vld [vmem:[%s362_s2] sm:$0x1f]  ;;  %v43_v36 = vld [vmem:[#allocation2 + $0x58] sm:$0xff]  ;;  %v37_v38 = vld [vmem:[#allocation2 + $0x28] sm:$0xff]  ;;  %s315_s2 = smov [#allocation5]  }
  0x13   :  { %249 = vmatpush.msk.msrb.mxu0 %vm78_vm0, %v66_v21  ;;  %244 = vmatmul.msk.f32.vlgmr.msra.gmra.mxu1 %vm74_vm1, %v31_v27  ;;  %v36_v37 = vld [vmem:[#allocation2 + $0x20] sm:$0xff]  ;;  %s229_s21 = sshll.u32 %s315_s2, 4  ;;  %s230_s21 = int_to_ptr.vmem [resolvable:$true] %s229_s21 }
  0x14   :  { %251 = vmatpush.msk.msrb.mxu1 %vm78_vm0, %v67_v22  ;;  %242 = vmatmul.msk.f32.vlgmr.msra.gmra.mxu0 %vm74_vm1, %v31_v27 }
  0x15   :  { %188 = vmatpush.msrb.mxu0 %v60_v25  ;;  %152 = vmatpush.msra.mxu2 %v34_v28 }
  0x16   :  { %208 = vmatpush.msrb.mxu1 %v61_v26  ;;  %172 = vmatpush.msra.mxu3 %v35_v29 }
  0x17   :  { %189 = vmatpush.msrb.mxu0 %v54_v30  ;;  %246 = vmatmul.msk.f32.vlgmr.msra.gmra.mxu2 %vm74_vm1, %v31_v27 }
  0x18   :  { %209 = vmatpush.msrb.mxu1 %v55_v31  ;;  %248 = vmatmul.msk.f32.vlgmr.msra.gmra.mxu3 %vm74_vm1, %v31_v27 }
  0x19   :  { %190 = vmatpush.msrb.mxu0 %v48_v32  ;;  %71 = vperm.xlu0 %258, %v68_v34  }
  0x1a   :  { %210 = vmatpush.msrb.mxu1 %v49_v33 }
  0x1b   :  { %191 = vmatpush.msrb.mxu0 %v42_v35 }
  0x1c   :  { %211 = vmatpush.msrb.mxu1 %v43_v36 }
  0x1d   :  { %192 = vmatpush.msrb.mxu0 %v36_v37 }
  0x1e   :  { %212 = vmatpush.msrb.mxu1 %v37_v38  ;;  %250 = vmatmul.msk.f32.vlgmr.msrb.gmra.mxu0 %vm74_vm1, %v31_v27 }
  0x1f   :  { %252 = vmatmul.msk.f32.vlgmr.msrb.gmra.mxu1 %vm74_vm1, %v31_v27 }
  0x8b   :  { %v72_v39 = vpop.permute.xlu0 %71 }
  0x90   :  { %v134_v41 = vpop.f32.mrf.mxu1 }
  0x91   :  { %v114_v40 = vpop.f32.mrf.mxu0  ;;  %v135_v43 = vadd.f32 %v134_v41, %v72_v39 }
  0x92   :  { %v115_v42 = vadd.f32 %v114_v40, %v72_v39 }
  0x93   :  { %218 = vst [vmem:[#allocation5 + $0x8] sm:$0x1f] %v135_v43 }
  0x94   :  { %217 = vst [vmem:[#allocation5] sm:$0x1f] %v115_v42 }
  0x9a   :  { %v154_v44 = vpop.f32.mrf.mxu2 }
  0x9b   :  { %v174_v45 = vpop.f32.mrf.mxu3  ;;  %v155_v46 = vadd.f32 %v154_v44, %v72_v39  ;;  %v194_v48 = vpop.f32.mrf.mxu0 }
  0x9c   :  { %v175_v47 = vadd.f32 %v174_v45, %v72_v39  ;;  %v214_v49 = vpop.f32.mrf.mxu1  ;;  %v195_v50 = vadd.f32 %v194_v48, %v72_v39 }
  0x9d   :  { %v215_v51 = vadd.f32 %v214_v49, %v72_v39  ;;  %219 = vst [vmem:[#allocation5 + $0x10] sm:$0x1f] %v155_v46 }
  0x9e   :  { %220 = vst [vmem:[#allocation5 + $0x18] sm:$0x1f] %v175_v47 }
  0x9f   :  { %221 = vst [vmem:[#allocation5 + $0x20] sm:$0x1f] %v195_v50 }
  0xa0   :  { %223 = vst.msk [vmem:[#allocation5 + $0x28] sm:$0x1f] %vm222_vm2, %v215_v51 }
  0xa1   :  { %234 = dma.vmem_to_hbm [thread:$0]  %s230_s21, 768, %s232_s24, [#allocation4]  }
  0xa2   :  { %309 = dma.done.wait [#allocation4], 768  }
  0xa3   :  { %310 = vsyncadd [#allocation4], 4294966528 }
  0xa4   :  { %239 = vsyncpa [#allocation3], 1 }
  0xa5   :  { %240 = vsyncpa [#allocation4], 1 }

</bundles_post_ra>
